<compile_context>
chip_gen: v5e
topology: v5e:2x2
jax: 0.10.0
libtpu: 0.0.40
codegen_flags: <defaults>
</compile_context>

<pallas_src>
import math
from functools import partial

import jax
import jax.numpy as jnp
from jax.experimental import pallas as pl
from jax.experimental.pallas import tpu as pltpu


# ----------------------------- small helpers (traced inside kernels) ---------

def _round_up(x, m):
    return ((x + m - 1) // m) * m


def _layer_norm(x, g, b, eps):
    mu = jnp.mean(x, axis=-1, keepdims=True)
    xc = x - mu
    var = jnp.mean(xc * xc, axis=-1, keepdims=True)
    return xc * jax.lax.rsqrt(var + eps) * g + b


def _gelu_tanh(x):
    # tanh-approx GELU (one EUP tanh per element); |err| vs exact erf-GELU
    # ~1e-3, below the bf16 quantization applied before the next matmul.
    c = math.sqrt(2.0 / math.pi)
    return 0.5 * x * (1.0 + jnp.tanh(c * (x + 0.044715 * x * x * x)))


# ----------------------------- kernel 1: patch embed + cls + pos -------------

def _patch_embed_kernel(patches_ref, w_ref, lng_ref, lnb_ref, cls_ref, pos_ref,
                        out_ref, *, L_real):
    # patches_ref: (1, L_pad, P) bf16; row 0 (cls slot) and rows >= L_real are zero.
    t = jnp.dot(patches_ref[0], w_ref[...],
                preferred_element_type=jnp.float32)                 # (L_pad, D) f32
    t = _layer_norm(t, lng_ref[...], lnb_ref[...], 1e-5)            # PatchEmbed LN
    L_pad = t.shape[0]
    row = jax.lax.broadcasted_iota(jnp.int32, (L_pad, 1), 0)
    tok = jnp.where(row == 0, cls_ref[...], t)                      # cls token -> row 0
    tok = jnp.where(row >= L_real, 0.0, tok)                        # zero alignment pad rows
    out_ref[0] = tok + pos_ref[...]                                 # + learnable pos embed


def patch_embed(patches_pad, w_col, ln_g, ln_b, cls_tok, pos_emb, L_real):
    BS, L_pad, P = patches_pad.shape
    D = w_col.shape[1]
    return pl.pallas_call(
        partial(_patch_embed_kernel, L_real=L_real),
        out_shape=jax.ShapeDtypeStruct((BS, L_pad, D), jnp.float32),
        grid=(BS,),
        in_specs=[
            pl.BlockSpec((1, L_pad, P), lambda b: (b, 0, 0)),
            pl.BlockSpec((P, D), lambda b: (0, 0)),
            pl.BlockSpec((1, D), lambda b: (0, 0)),
            pl.BlockSpec((1, D), lambda b: (0, 0)),
            pl.BlockSpec((1, D), lambda b: (0, 0)),
            pl.BlockSpec((L_pad, D), lambda b: (0, 0)),
        ],
        out_specs=pl.BlockSpec((1, L_pad, D), lambda b: (b, 0, 0)),
        compiler_params=pltpu.CompilerParams(dimension_semantics=("parallel",)),
    )(patches_pad, w_col, ln_g, ln_b, cls_tok, pos_emb)


# ------------------- kernel 2: fused transformer stack + head ----------------

def _stack_kernel(x_ref, ln1g_ref, ln1b_ref, wqkv_ref, bqkv_ref, bk_ref, bv_ref,
                  wo_ref, bo_ref, ln2g_ref, ln2b_ref, w1_ref, b1_ref, w2_ref,
                  b2_ref, hlng_ref, hlnb_ref, hw_ref,
                  feat_ref, act_ref, *, num_heads, L_real, clip_tile):
    blk = pl.program_id(1)
    last_blk = pl.num_programs(1) - 1

    # First block of each clip group: seed the VMEM-resident activation buffer.
    @pl.when(blk == 0)
    def _():
        act_ref[...] = x_ref[...]

    _, L_pad, D = act_ref.shape
    hd = D // num_heads

    row = jax.lax.broadcasted_iota(jnp.int32, (L_pad, 1), 0)
    col = jax.lax.broadcasted_iota(jnp.int32, (1, L_pad), 1)
    is_bias_row = row == L_real          # spare row carries bias_k / bias_v
    col_valid = col <= L_real            # real tokens + bias_kv token
    is_real_row = row < L_real

    w_out = wo_ref[0]                    # (D, D) bf16, shared by all clips in tile

    # Per-clip inner loop: weights stay resident while TB clips are processed
    # (amortizes the ~14 MB/block weight DMA); intermediates stay per-clip so
    # VMEM pressure does not grow with the clip tile (v7x: 64 MiB).
    for c in range(clip_tile):
        x = act_ref[c]                   # (L_pad, D) f32

        # --- attention (nn.MultiheadAttention, bias=True, add_bias_kv=True) ---
        h = _layer_norm(x, ln1g_ref[0], ln1b_ref[0], 1e-6)
        qkv = jnp.dot(h.astype(jnp.bfloat16), wqkv_ref[0],
                      preferred_element_type=jnp.float32) + bqkv_ref[0]  # (L_pad, 3D)

        # 1/sqrt(hd) already folded into W_q / b_q at init.
        q_bf = qkv[:, :D].astype(jnp.bfloat16)
        k_bf = jnp.where(is_bias_row, bk_ref[0], qkv[:, D:2 * D]).astype(jnp.bfloat16)
        v_bf = jnp.where(is_bias_row, bv_ref[0], qkv[:, 2 * D:]).astype(jnp.bfloat16)

        head_outs = []
        for hh in range(num_heads):
            lo = hh * hd
            hi = lo + hd
            # q @ k^T without an explicit transpose op.
            s = jax.lax.dot_general(q_bf[:, lo:hi], k_bf[:, lo:hi],
                                    (((1,), (1,)), ((), ())),
                                    preferred_element_type=jnp.float32)  # (L_pad, L_pad)
            s = jnp.where(col_valid, s, -1e30)      # mask alignment pad columns
            m = jnp.max(s, axis=-1, keepdims=True)
            p = jnp.exp(s - m)
            denom = jnp.sum(p, axis=-1, keepdims=True)
            p = p * pl.reciprocal(denom, approx=True)          # EUP reciprocal
            oh = jnp.dot(p.astype(jnp.bfloat16), v_bf[:, lo:hi],
                         preferred_element_type=jnp.float32)   # (L_pad, hd)
            head_outs.append(oh.astype(jnp.bfloat16))

        # Single K=D out-projection (instead of num_heads K=hd matmuls).
        attn = jnp.dot(jnp.concatenate(head_outs, axis=-1), w_out,
                       preferred_element_type=jnp.float32)
        x = x + attn + bo_ref[0]         # drop_path == identity at inference

        # --- MLP ---
        h2 = _layer_norm(x, ln2g_ref[0], ln2b_ref[0], 1e-6)
        mlp = jnp.dot(h2.astype(jnp.bfloat16), w1_ref[0],
                      preferred_element_type=jnp.float32) + b1_ref[0]
        mlp = _gelu_tanh(mlp)
        mlp = jnp.dot(mlp.astype(jnp.bfloat16), w2_ref[0],
                      preferred_element_type=jnp.float32) + b2_ref[0]

        # Re-zero alignment/bias rows so they never drift toward Inf/NaN.
        x = jnp.where(is_real_row, x + mlp, 0.0)
        act_ref[c] = x

        # --- fused head + postprocess on the last block ---
        @pl.when(blk == last_blk)
        def _():
            cls8 = x[0:8, :]                                        # row 0 = CLS
            hh8 = _layer_norm(cls8, hlng_ref[...], hlnb_ref[...], 1e-6)
            y = jnp.dot(hh8.astype(jnp.bfloat16), hw_ref[...],
                        preferred_element_type=jnp.float32)         # (8, OUT)
            ss = jnp.sum(y * y, axis=-1, keepdims=True)
            y = y * jax.lax.rsqrt(jnp.maximum(ss, 1e-24)) * 20.0    # F.normalize * 20
            feat_ref[0, pl.ds(c, 1), :] = y[0:1, :]                 # SelectElement(0)


def transformer_stack_and_head(x, params, num_heads, L_real, clip_tile):
    BS, L_pad, D = x.shape
    NB, _, D3 = params["blk_w_qkv"].shape
    HID = params["blk_w1"].shape[2]
    OUT = params["head_w"].shape[1]
    assert BS % clip_tile == 0
    n_groups = BS // clip_tile

    def xmap(b, blk):                 # tokens: constant over the block axis ->
        return (b, 0, 0)              # fetched once per clip group (revisiting)

    def wmap(b, blk):                 # block weights: one stacked slice per block
        return (blk, 0, 0)

    def cmap(b, blk):                 # head params: constant -> fetched once
        return (0, 0)

    in_specs = [
        pl.BlockSpec((clip_tile, L_pad, D), xmap),   # tokens
        pl.BlockSpec((1, 1, D), wmap),               # ln1_g
        pl.BlockSpec((1, 1, D), wmap),               # ln1_b
        pl.BlockSpec((1, D, D3), wmap),              # fused in-proj weight (bf16)
        pl.BlockSpec((1, 1, D3), wmap),              # fused in-proj bias
        pl.BlockSpec((1, 1, D), wmap),               # bias_k
        pl.BlockSpec((1, 1, D), wmap),               # bias_v
        pl.BlockSpec((1, D, D), wmap),               # out-proj weight (bf16)
        pl.BlockSpec((1, 1, D), wmap),               # out-proj bias
        pl.BlockSpec((1, 1, D), wmap),               # ln2_g
        pl.BlockSpec((1, 1, D), wmap),               # ln2_b
        pl.BlockSpec((1, D, HID), wmap),             # mlp w1 (bf16)
        pl.BlockSpec((1, 1, HID), wmap),             # mlp b1
        pl.BlockSpec((1, HID, D), wmap),             # mlp w2 (bf16)
        pl.BlockSpec((1, 1, D), wmap),               # mlp b2
        pl.BlockSpec((1, D), cmap),                  # head ln_g
        pl.BlockSpec((1, D), cmap),                  # head ln_b
        pl.BlockSpec((D, OUT), cmap),                # head weight (bf16)
    ]

    feats = pl.pallas_call(
        partial(_stack_kernel, num_heads=num_heads, L_real=L_real,
                clip_tile=clip_tile),
        out_shape=jax.ShapeDtypeStruct((n_groups, clip_tile, OUT), jnp.float32),
        grid=(n_groups, NB),
        in_specs=in_specs,
        out_specs=pl.BlockSpec((1, clip_tile, OUT), lambda b, blk: (b, 0, 0)),
        scratch_shapes=[pltpu.VMEM((clip_tile, L_pad, D), jnp.float32)],
        compiler_params=pltpu.CompilerParams(
            dimension_semantics=("parallel", "arbitrary"),
            # Safe on every chip (v7x physical VMEM is 64 MiB); on v6e/v5e this
            # could be raised to ~112 MiB together with a larger clip tile.
            vmem_limit_bytes=56 * 1024 * 1024),
    )(x,
      params["blk_ln1_g"], params["blk_ln1_b"],
      params["blk_w_qkv"], params["blk_b_qkv"],
      params["blk_bias_k"], params["blk_bias_v"],
      params["blk_wo"], params["blk_bo"],
      params["blk_ln2_g"], params["blk_ln2_b"],
      params["blk_w1"], params["blk_b1"],
      params["blk_w2"], params["blk_b2"],
      params["head_ln_g"], params["head_ln_b"], params["head_w"])
    return feats.reshape(BS, OUT)


# ----------------------------- glue: im2col, params, full forward ------------

def _dims(cfg):
    K, S = cfg["kernel"], cfg["stride"]
    OH = (cfg["mel"] - K) // S + 1
    OW = (cfg["tlen"] - K) // S + 1
    N = OH * OW
    L_real = N + 1                               # patches + cls token
    L_pad = _round_up(L_real + 1, 8)             # +1 spare row for bias_kv, 8-aligned
    P = K * K                                    # C == 1
    return N, L_real, L_pad, P


def _extract_patches(x, ksize, stride):
    # x: (BS, C, H, W)  NCHW, same as PyTorch Conv2d input.
    patches = jax.lax.conv_general_dilated_patches(
        x, filter_shape=(ksize, ksize), window_strides=(stride, stride),
        padding="VALID", dimension_numbers=("NCHW", "OIHW", "NCHW"))
    BS, CKK, OH, OW = patches.shape
    # (BS, N, C*K*K); ordering matches conv weight.reshape(D, C*K*K) for C == 1.
    return patches.reshape(BS, CKK, OH * OW).transpose(0, 2, 1)


def _pick_clip_tile(bs, max_tb=4):
    # Largest divisor of the clip-batch up to max_tb (avoids padding).
    for t in range(min(max_tb, bs), 0, -1):
        if bs % t == 0:
            return t
    return 1


def init_params(key, cfg):
    D = cfg["embed_dim"]
    K = cfg["kernel"]
    OUT = cfg["out_embed_dim"]
    HID = cfg["mlp_ratio"] * D
    NB = cfg["num_blocks"]
    _, L_real, L_pad, _ = _dims(cfg)

    keys = iter(jax.random.split(key, 16))

    def nrm(shape, std=0.02):
        return (std * jax.random.normal(next(keys), shape)).astype(jnp.float32)

    conv_w = nrm((D, 1, K, K))                   # PyTorch Conv2d weight layout (O,I,Kh,Kw)
    pos = nrm((L_real, D))

    # Fold the 1/sqrt(head_dim) attention scale into the Q columns of the fused
    # in-projection (mathematically identical to scaling q after projection).
    qscale = 1.0 / math.sqrt(D // cfg["num_heads"])
    w_qkv = nrm((NB, D, 3 * D))
    b_qkv = nrm((NB, 1, 3 * D))
    w_qkv = w_qkv.at[:, :, :D].multiply(qscale)
    b_qkv = b_qkv.at[:, :, :D].multiply(qscale)

    params = {
        # patch embed (Conv2d as im2col matmul); matmul weights stored in bf16
        "conv_w_col": conv_w.reshape(D, -1).T.astype(jnp.bfloat16),     # (C*K*K, D)
        "pe_ln_g": jnp.ones((1, D), jnp.float32),
        "pe_ln_b": jnp.zeros((1, D), jnp.float32),
        "cls_token": nrm((1, D)),
        "pos_embed": jnp.pad(pos, ((0, L_pad - L_real), (0, 0))),       # pad rows zeroed
        # head
        "head_ln_g": jnp.ones((1, D), jnp.float32),
        "head_ln_b": jnp.zeros((1, D), jnp.float32),
        "head_w": nrm((D, OUT)).astype(jnp.bfloat16),
        # transformer blocks, stacked along a leading block axis for the fused kernel
        "blk_ln1_g": jnp.ones((NB, 1, D), jnp.float32),
        "blk_ln1_b": jnp.zeros((NB, 1, D), jnp.float32),
        "blk_w_qkv": w_qkv.astype(jnp.bfloat16),
        "blk_b_qkv": b_qkv,
        "blk_bias_k": nrm((NB, 1, D)),
        "blk_bias_v": nrm((NB, 1, D)),
        "blk_wo": nrm((NB, D, D)).astype(jnp.bfloat16),
        "blk_bo": nrm((NB, 1, D)),
        "blk_ln2_g": jnp.ones((NB, 1, D), jnp.float32),
        "blk_ln2_b": jnp.zeros((NB, 1, D), jnp.float32),
        "blk_w1": nrm((NB, D, HID)).astype(jnp.bfloat16),
        "blk_b1": nrm((NB, 1, HID)),
        "blk_w2": nrm((NB, HID, D)).astype(jnp.bfloat16),
        "blk_b2": nrm((NB, 1, D)),
    }
    return params


def imagebind_audio_model_forward(params, audios, cfg):
    # ImageBindAudioModel.forward
    reduce_list = audios.ndim >= 5
    if reduce_list:
        B, S = audios.shape[:2]
        x = audios.reshape((B * S,) + audios.shape[2:])
    else:
        x = audios

    N, L_real, L_pad, _ = _dims(cfg)
    patches = _extract_patches(x, cfg["kernel"], cfg["stride"])      # (BS, N, C*K*K)
    assert patches.shape[1] == N, (patches.shape, N)
    # One zero row in front (cls slot) + zero rows at the end -> 8-aligned L_pad rows.
    patches = jnp.pad(patches, ((0, 0), (1, L_pad - L_real), (0, 0)))
    patches = patches.astype(jnp.bfloat16)

    tokens = patch_embed(patches, params["conv_w_col"], params["pe_ln_g"],
                         params["pe_ln_b"], params["cls_token"],
                         params["pos_embed"], L_real)                # (BS, L_pad, D) f32

    clip_tile = _pick_clip_tile(tokens.shape[0])
    feats = transformer_stack_and_head(tokens, params, cfg["num_heads"],
                                       L_real, clip_tile)            # (BS, OUT)
    if reduce_list:
        feats = feats.reshape(B, S, -1)
        if feats.shape[0] == 1:          # torch .squeeze(0) semantics
            feats = feats[0]
    return feats


def imagebind_audio_tower_forward(params, audios, cfg):
    # ImageBindAudioTower.forward: list -> list of features, array -> features
    if isinstance(audios, list):
        return [imagebind_audio_model_forward(params, a, cfg) for a in audios]
    return imagebind_audio_model_forward(params, audios, cfg)


# ----------------------------- demo ------------------------------------------

if __name__ == "__main__":
    # Small synthetic config (full model: D=768, 12 blocks, 12 heads, mel=128,
    # target_len=204, out=1024 -- same code, scaled down here but 128-lane aligned).
    cfg = dict(kernel=16, stride=10, embed_dim=128, num_heads=4, num_blocks=2,
               mlp_ratio=4, out_embed_dim=256, mel=48, tlen=36)

    key = jax.random.PRNGKey(0)
    pkey, dkey = jax.random.split(key)
    params = init_params(pkey, cfg)

    # (B=2 audios, S=3 clips per audio, C=1, MEL, TIME) normalized mel spectrograms
    audios = jax.random.normal(dkey, (2, 3, 1, cfg["mel"], cfg["tlen"]), jnp.float32)

    out = imagebind_audio_tower_forward(params, audios, cfg)
    out = jax.block_until_ready(out)

    assert out.shape == (2, 3, cfg["out_embed_dim"]), out.shape
    assert bool(jnp.all(jnp.isfinite(out)))
    # postprocess guarantees ||feature||_2 == 20 per clip
    norms = jnp.sqrt(jnp.sum(out * out, axis=-1))
    assert bool(jnp.all(jnp.abs(norms - 20.0) < 1e-3)), norms

    print("KERNEL_OK")
</pallas_src>

<mosaic_0001>
module attributes {stable_mosaic.version = 11 : i64} {
  func.func @_patch_embed_kernel(%arg0: i32, %arg1: memref<1x16x256xbf16, #tpu.memory_space<vmem>>, %arg2: memref<256x128xbf16, #tpu.memory_space<vmem>>, %arg3: memref<1x128xf32, #tpu.memory_space<vmem>>, %arg4: memref<1x128xf32, #tpu.memory_space<vmem>>, %arg5: memref<1x128xf32, #tpu.memory_space<vmem>>, %arg6: memref<16x128xf32, #tpu.memory_space<vmem>>, %arg7: memref<1x16x128xf32, #tpu.memory_space<vmem>>) attributes {dimension_semantics = [#tpu.dimension_semantics<parallel>], iteration_bounds = array<i64: 6>, scalar_prefetch = 0 : i64, scratch_operands = 0 : i64, tpu.core_type = #tpu.core_type<tc>, window_params = [{transform_indices = @transform_0, window_bounds = array<i64: 1, 16, 256>}, {pipeline_mode = #tpu.pipeline_mode<synchronous>, transform_indices = @transform_1, window_bounds = array<i64: 256, 128>}, {pipeline_mode = #tpu.pipeline_mode<synchronous>, transform_indices = @transform_2, window_bounds = array<i64: 1, 128>}, {pipeline_mode = #tpu.pipeline_mode<synchronous>, transform_indices = @transform_3, window_bounds = array<i64: 1, 128>}, {pipeline_mode = #tpu.pipeline_mode<synchronous>, transform_indices = @transform_4, window_bounds = array<i64: 1, 128>}, {pipeline_mode = #tpu.pipeline_mode<synchronous>, transform_indices = @transform_5, window_bounds = array<i64: 16, 128>}, {transform_indices = @transform_6, window_bounds = array<i64: 1, 16, 128>}]} {
    %c0 = arith.constant 0 : index
    %c0_0 = arith.constant 0 : index
    %c0_1 = arith.constant 0 : index
    %0 = vector.load %arg1[%c0, %c0_0, %c0_1] : memref<1x16x256xbf16, #tpu.memory_space<vmem>>, vector<1x16x256xbf16>
    %1 = vector.shape_cast %0 : vector<1x16x256xbf16> to vector<16x256xbf16>
    %c0_2 = arith.constant 0 : index
    %c0_3 = arith.constant 0 : index
    %2 = vector.load %arg2[%c0_2, %c0_3] : memref<256x128xbf16, #tpu.memory_space<vmem>>, vector<256x128xbf16>
    %cst = arith.constant dense<0.000000e+00> : vector<16x128xf32>
    %3 = tpu.matmul %1, %2, %cst {dimension_numbers = #tpu.dot_dimension_numbers<[1], [0], [0], [1], [0, 0, 1, 1], [], []>} : vector<16x256xbf16>, vector<256x128xbf16>, vector<16x128xf32> -> vector<16x128xf32>
    %c0_4 = arith.constant 0 : index
    %c0_5 = arith.constant 0 : index
    %4 = vector.load %arg3[%c0_4, %c0_5] : memref<1x128xf32, #tpu.memory_space<vmem>>, vector<1x128xf32>
    %c0_6 = arith.constant 0 : index
    %c0_7 = arith.constant 0 : index
    %5 = vector.load %arg4[%c0_6, %c0_7] : memref<1x128xf32, #tpu.memory_space<vmem>>, vector<1x128xf32>
    %cst_8 = arith.constant dense<0.000000e+00> : vector<16xf32>
    %6 = vector.multi_reduction <add>, %3, %cst_8 [1] : vector<16x128xf32> to vector<16xf32>
    %7 = vector.shape_cast %6 : vector<16xf32> to vector<16x1xf32>
    %cst_9 = arith.constant 1.280000e+02 : f32
    %8 = vector.broadcast %cst_9 : f32 to vector<16x1xf32>
    %9 = arith.divf %7, %8 : vector<16x1xf32>
    %10 = vector.broadcast %9 : vector<16x1xf32> to vector<16x128xf32>
    %11 = arith.subf %3, %10 : vector<16x128xf32>
    %12 = arith.mulf %11, %11 : vector<16x128xf32>
    %cst_10 = arith.constant dense<0.000000e+00> : vector<16xf32>
    %13 = vector.multi_reduction <add>, %12, %cst_10 [1] : vector<16x128xf32> to vector<16xf32>
    %14 = vector.shape_cast %13 : vector<16xf32> to vector<16x1xf32>
    %cst_11 = arith.constant 1.280000e+02 : f32
    %15 = vector.broadcast %cst_11 : f32 to vector<16x1xf32>
    %16 = arith.divf %14, %15 : vector<16x1xf32>
    %cst_12 = arith.constant 9.99999974E-6 : f32
    %17 = vector.broadcast %cst_12 : f32 to vector<16x1xf32>
    %18 = arith.addf %16, %17 : vector<16x1xf32>
    %19 = math.rsqrt %18 : vector<16x1xf32>
    %20 = vector.broadcast %19 : vector<16x1xf32> to vector<16x128xf32>
    %21 = arith.mulf %11, %20 : vector<16x128xf32>
    %22 = vector.broadcast %4 : vector<1x128xf32> to vector<16x128xf32>
    %23 = arith.mulf %21, %22 : vector<16x128xf32>
    %24 = vector.broadcast %5 : vector<1x128xf32> to vector<16x128xf32>
    %25 = arith.addf %23, %24 : vector<16x128xf32>
    %26 = tpu.iota {dimensions = array<i32: 0>} : vector<16x1xi32>
    %c0_i32 = arith.constant 0 : i32
    %27 = vector.broadcast %c0_i32 : i32 to vector<16x1xi32>
    %28 = arith.cmpi eq, %26, %27 : vector<16x1xi32>
    %c0_13 = arith.constant 0 : index
    %c0_14 = arith.constant 0 : index
    %29 = vector.load %arg5[%c0_13, %c0_14] : memref<1x128xf32, #tpu.memory_space<vmem>>, vector<1x128xf32>
    %30 = vector.shape_cast %28 : vector<16x1xi1> to vector<16x1xi1>
    %31 = vector.broadcast %30 : vector<16x1xi1> to vector<16x128xi1>
    %32 = vector.shape_cast %29 : vector<1x128xf32> to vector<1x128xf32>
    %33 = vector.broadcast %32 : vector<1x128xf32> to vector<16x128xf32>
    %34 = arith.select %31, %33, %25 : vector<16x128xi1>, vector<16x128xf32>
    %c13_i32 = arith.constant 13 : i32
    %35 = vector.broadcast %c13_i32 : i32 to vector<16x1xi32>
    %36 = arith.cmpi sge, %26, %35 : vector<16x1xi32>
    %cst_15 = arith.constant 0.000000e+00 : f32
    %37 = vector.shape_cast %36 : vector<16x1xi1> to vector<16x1xi1>
    %38 = vector.broadcast %37 : vector<16x1xi1> to vector<16x128xi1>
    %39 = vector.broadcast %cst_15 : f32 to vector<16x128xf32>
    %40 = arith.select %38, %39, %34 : vector<16x128xi1>, vector<16x128xf32>
    %c0_16 = arith.constant 0 : index
    %c0_17 = arith.constant 0 : index
    %41 = vector.load %arg6[%c0_16, %c0_17] : memref<16x128xf32, #tpu.memory_space<vmem>>, vector<16x128xf32>
    %42 = arith.addf %40, %41 : vector<16x128xf32>
    %c0_18 = arith.constant 0 : index
    %c0_19 = arith.constant 0 : index
    %c0_20 = arith.constant 0 : index
    %43 = vector.load %arg7[%c0_18, %c0_19, %c0_20] : memref<1x16x128xf32, #tpu.memory_space<vmem>>, vector<1x16x128xf32>
    %44 = vector.shape_cast %43 : vector<1x16x128xf32> to vector<16x128xf32>
    %45 = vector.shape_cast %42 : vector<16x128xf32> to vector<1x16x128xf32>
    tpu.vector_store %arg7[%c0_18, %c0_19, %c0_20], %45 {strides = array<i32>} : memref<1x16x128xf32, #tpu.memory_space<vmem>>, vector<1x16x128xf32>,
    return
  }
  func.func @transform_0(%arg0: i32) -> (i32, i32, i32) {
    %c0_i32 = arith.constant 0 : i32
    %c0_i32_0 = arith.constant 0 : i32
    %c0_i32_1 = arith.constant 0 : i32
    return %arg0, %c0_i32, %c0_i32_0 : i32, i32, i32
  }
  func.func @transform_1(%arg0: i32) -> (i32, i32) {
    %c0_i32 = arith.constant 0 : i32
    %c0_i32_0 = arith.constant 0 : i32
    %c0_i32_1 = arith.constant 0 : i32
    return %c0_i32, %c0_i32_0 : i32, i32
  }
  func.func @transform_2(%arg0: i32) -> (i32, i32) {
    %c0_i32 = arith.constant 0 : i32
    %c0_i32_0 = arith.constant 0 : i32
    %c0_i32_1 = arith.constant 0 : i32
    return %c0_i32, %c0_i32_0 : i32, i32
  }
  func.func @transform_3(%arg0: i32) -> (i32, i32) {
    %c0_i32 = arith.constant 0 : i32
    %c0_i32_0 = arith.constant 0 : i32
    %c0_i32_1 = arith.constant 0 : i32
    return %c0_i32, %c0_i32_0 : i32, i32
  }
  func.func @transform_4(%arg0: i32) -> (i32, i32) {
    %c0_i32 = arith.constant 0 : i32
    %c0_i32_0 = arith.constant 0 : i32
    %c0_i32_1 = arith.constant 0 : i32
    return %c0_i32, %c0_i32_0 : i32, i32
  }
  func.func @transform_5(%arg0: i32) -> (i32, i32) {
    %c0_i32 = arith.constant 0 : i32
    %c0_i32_0 = arith.constant 0 : i32
    %c0_i32_1 = arith.constant 0 : i32
    return %c0_i32, %c0_i32_0 : i32, i32
  }
  func.func @transform_6(%arg0: i32) -> (i32, i32, i32) {
    %c0_i32 = arith.constant 0 : i32
    %c0_i32_0 = arith.constant 0 : i32
    %c0_i32_1 = arith.constant 0 : i32
    return %arg0, %c0_i32, %c0_i32_0 : i32, i32, i32
  }
}

</mosaic_0001>

<bundles_post_ra>
// kernel: tpu_custom_call.1
= control target key start
LH: loop header
LB: loop body
LE: loop exit
PB: predicated region body
PF: predicated region fallthrough
CT: control target
= control target key end

     0   :  { %11 = vsyncpa [#allocation3], 0  ;;  %s1232_s0 = inlined_call_operand.hbm [shape: bf16[6,16,256], index: 0, kind: input, shape index: {}]   ;;  %s1233_s1 = inlined_call_operand.hbm [shape: bf16[256,128], index: 1, kind: input, shape index: {}]   ;;  %s1234_s2 = inlined_call_operand.vmem [shape: f32[1,128], index: 2, kind: input, shape index: {}]   ;;  %s1235_s3 = inlined_call_operand.vmem [shape: f32[1,128], index: 3, kind: input, shape index: {}]   ;;  %s1236_s4 = inlined_call_operand.vmem [shape: f32[1,128], index: 4, kind: input, shape index: {}]   ;;  %s1237_s5 = inlined_call_operand.hbm [shape: f32[16,128], index: 5, kind: input, shape index: {}]   ;;  %s1238_s6 = inlined_call_operand.hbm [shape: f32[6,16,128], index: 6, kind: output, shape index: {}]  }
   0x1   :  { %13 = vsyncpa [#allocation3 + $0x1], 0 }
   0x2   :  { %14 = vsyncpa [#allocation6], 0 }
   0x3   :  { %15 = vsyncpa [#allocation4], 0 }
   0x4   :  { %17 = vsyncpa [#allocation4 + $0x1], 0  ;;  %s1068_s21 = smov 0   ;;  %s1070_s22 = smov 0  }
   0x5   :  { %s1072_s23 = smov 0   ;;  %s1074_s24 = smov 0  }
   0x6 LB: > { %s1089_s25 = sadd.s32 4294967295, %s1022_s24   ;;  %s669_s26 = sadd.s32 4294967294, %s1022_s24   ;;  %s1022_s24 = sphi %s1074_s24, %s1251_s24   ;;  %s1018_s23 = sphi %s1072_s23, %s1250_s23   ;;  %s1014_s22 = sphi %s1070_s22, %s1249_s22   ;;  %s1010_s21 = sphi %s1068_s21, %s1248_s21  }
   0x7   : > { %p43_p0 = scmp.ne.s32.totalorder %s1014_s22, %s1010_s21  ;;  %p44_p1 = scmp.eq.s32.totalorder %s1089_s25, 0 }
   0x8   : > { %p172_p2 = scmp.eq.s32.totalorder %s1089_s25, 5  ;;  %p178_p3 = scmp.eq.s32.totalorder %s669_s26, 5 }
   0x9   : > { %p1098_p4 = por %p44_p1, %p43_p0  ;;  %p670_p5 = scmp.ge.s32.totalorder %s1022_s24, 1 }
   0xa   : > { %p1103_p6 = por %p178_p3, %p43_p0  ;;  %p185_p7 = scmp.lt.s32.totalorder %s1022_s24, 7 }
   0xb   : > { %s196_s7 = sshll.u32 %s1233_s1, 4  ;;  %s1024_s9 = smov [#allocation5]   ;;  %s197_s7 = int_to_ptr.hbm [resolvable:$true] %s196_s7 }
   0xc   : > { %p1111_p8 = pnand %p670_p5, %p185_p7  ;;  %s198_s10 = sshll.u32 %s1024_s9, 4  ;;  %s199_s10 = int_to_ptr.vmem [resolvable:$true] %s198_s10 }
   0xd   : > { %s219_s13 = sshll.u32 %s1237_s5, 4  ;;  %s1025_s14 = smov 64   ;;  %s220_s13 = int_to_ptr.hbm [resolvable:$true] %s219_s13 }
   0xe   : > { %p791_p9 = pneg %p1111_p8  ;;  %s1026_s15 = smov 4  }
   0xf   : > { %s1027_s16 = smov [#allocation7]   ;;  %s1239_s18 = smov 128  }
  0x10   : > { %p792_p10 = pnand %p791_p9, %p44_p1  ;;  %s221_s17 = sshll.u32 %s1027_s16, 4  ;;  %s222_s17 = int_to_ptr.vmem [resolvable:$true] %s221_s17 }
  0x11   : > { %s1240_s19 = smov 8   ;;  %s1126_s20 = sadd.s32 1, %s1022_s24  }
  0x12   : > { %794 = dma.hbm_to_vmem [thread:$0]  (!%p792_p10), %s197_s7, 2048, %s199_s10, [#allocation6], %s1025_s14, %s1025_s14, %s1026_s15  }
  0x13   : > { %797 = dma.hbm_to_vmem [thread:$0]  (!%p792_p10), %s220_s13, 256, %s222_s17, [#allocation6], %s1239_s18, %s1239_s18, %s1240_s19  }
  0x14   : > { %s27_s26 = ssub.s32 %s1022_s24, %s1126_s20  ;;  %s30_s29 = sadd.s32 1, %s1018_s23 }
  0x15   : > { %p28_p11 = scmp.eq.s32.totalorder %s27_s26, 0  ;;  %p37_p12 = scmp.ne.s32.totalorder %s1018_s23, %s1014_s22 }
  0x16   : > { %p38_p13 = scmp.eq.s32.totalorder %s1022_s24, 0  ;;  %p808_p5 = scmp.lt.s32.totalorder %s1022_s24, 6 }
  0x17   : > { %s1135_s30 = scalar_select %p28_p11, %s1018_s23, %s30_s29  }
  0x18   : > { %p39_p0 = por %p38_p13, %p37_p12  ;;  %p1139_p3 = por %p172_p2, %p37_p12 }
  0x19   : > { %s235_s9 = sand.u32 1, %s1018_s23   ;;  %s759_s11 = sshll.u32 %s1022_s24, 4 }
  0x1a   : > { %s674_s10 = sshll.u32 %s235_s9, 4  ;;  %s244_s14 = scalar_lea.hbm %s1232_s0, %s759_s11 }
  0x1b   : > { %s239_s15 = scalar_lea.vmem [#allocation2], %s674_s10  ;;  %s245_s17 = sshll.u32 %s244_s14, 4  ;;  %s246_s17 = int_to_ptr.hbm [resolvable:$true] %s245_s17 }
  0x1c   : > { %s247_s16 = sshll.u32 %s239_s15, 4  ;;  %p1149_p7 = pnand %p808_p5, %p39_p0  ;;  %s248_s16 = int_to_ptr.vmem [resolvable:$true] %s247_s16 }
  0x1d   : > { %s236_s29 = scalar_lea.sflag [#allocation3], %s235_s9  ;;  %s922_s18 = sshra.s32 %s246_s17, 4  ;;  %s923_s18 = int_to_ptr.hbm [resolvable:$true] %s922_s18 }
  0x1e   : > { %s924_s19 = scalar_lea.hbm %s923_s18, 16  ;;  %p926_p9 = pneg %p1149_p7 }
  0x1f   : > { %p925_p2 = scmp.ne.s32.totalorder %s923_s18, %s924_s19  ;;  %s929_s12 = scalar_lea.hbm %s1232_s0, 96 }
  0x20   : > { %p930_p12 = scmp.lt.s32.totalorder %s923_s18, %s1232_s0  ;;  %p931_p13 = scmp.lt.s32.totalorder %s929_s12, %s924_s19 }
  0x21   : > { %p927_p10 = pnand %p926_p9, %p925_p2 }
  0x22   : > { %p932_p0 = por %p931_p13, %p930_p12 }
  0x23   : > { %p928_p11 = pneg %p927_p10 }
  0x25   : > { %p933_p5 = pnand %p932_p0, %p928_p11 }
  0x27   : > { %936 = shalt.err (!%p933_p5)
}
  0x28   : > { %s1246_s9 = smov 8   ;;  %s1247_s15 = smov 128  }
  0x29   : > { %801 = dma.hbm_to_vmem [thread:$0]  (!%p1149_p7), %s246_s17, 256, %s248_s16, %s236_s29, %s1247_s15, %s1247_s15, %s1246_s9  }
  0x2a   : > { %259 = sbr.rel (%p1111_p8) target bundleno = 492 (0x1ec), region = 44  ;;  %s1169_s11 = sand.u32 (!%p1111_p8), 1, %s1014_s22  }
  0x2b   : > { %s678_s18 = sshll.u32 (!%p1111_p8), %s1169_s11, 4  ;;  %s262_s19 = scalar_lea.sflag (!%p1111_p8), [#allocation3], %s1169_s11 }
  0x2c   : > { %s1175_s10 = scalar_lea.vmem (!%p1111_p8), [#allocation2], %s678_s18 }
  0x2f   : > { %997 = dma.done.wait (%p1098_p4), %s262_s19, 256  }
  0x30   : > { %999 = vsyncadd (%p1098_p4), %s262_s19, 4294967040 }
  0x31   : > { %1001 = dma.done.wait (%p44_p1), [#allocation6], 2304  }
  0x32   : > { %1003 = vsyncadd (%p44_p1), [#allocation6], 4294964992  ;;  %v769_v0 = vld [vmem:[#allocation5 + $0x38] sm:$0xff]  ;;  %v768_v2 = vld [vmem:[#allocation5 + $0x30] sm:$0xff]  ;;  %v1030_v28 = vmov 128.0   ;;  %v532_v53 = vlaneseq  ;;  %s778_s12 = sshll.u32 %s1089_s25, 4 }
  0x33   : > { %v777_v1 = vld [vmem:[#allocation5 + $0x78] sm:$0xff]  ;;  %445 = vmatpush.bf16.msra.mxu0 %v769_v0  ;;  %v776_v3 = vld [vmem:[#allocation5 + $0x70] sm:$0xff]  ;;  %v767_v4 = vld [vmem:[#allocation5 + $0x28] sm:$0xff]  ;;  %856 = vrcp.f32 %v1030_v28  ;;  %s573_s9 = scalar_lea.hbm %s1238_s6, %s778_s12  ;;  %s304_s15 = scalar_lea.vmem [#allocation8], %s678_s18 }
  0x34   : > { %459 = vmatpush.bf16.msra.mxu1 %v777_v1  ;;  %v775_v5 = vld [vmem:[#allocation5 + $0x68] sm:$0xff]  ;;  %v766_v6 = vld [vmem:[#allocation5 + $0x20] sm:$0xff]  ;;  %v765_v8 = vld [vmem:[#allocation5 + $0x18] sm:$0xff]  ;;  %v533_v59 = vshrl.u32 %v532_v53, 7  ;;  %s574_s19 = sshll.u32 %s304_s15, 4  ;;  %s562_s25 = scalar_lea.sflag [#allocation4], %s1169_s11  ;;  %s575_s19 = int_to_ptr.vmem [resolvable:$true] %s574_s19 }
  0x35   : > { %v774_v7 = vld [vmem:[#allocation5 + $0x60] sm:$0xff]  ;;  %v773_v9 = vld [vmem:[#allocation5 + $0x58] sm:$0xff]  ;;  %v764_v10 = vld [vmem:[#allocation5 + $0x10] sm:$0xff]  ;;  %s972_s17 = scalar_lea.hbm %s1238_s6, 96 }
  0x36   : > { %v772_v11 = vld [vmem:[#allocation5 + $0x50] sm:$0xff]  ;;  %v763_v12 = vld [vmem:[#allocation5 + $0x8] sm:$0xff]  ;;  %v762_v14 = vld [vmem:[#allocation5] sm:$0xff]  ;;  %vm535_vm4 = vcmp.eq.s32.totalorder %v533_v59, 0 }
  0x37   : > { %446 = vmatpush.bf16.msra.mxu0 %v768_v2  ;;  %v771_v13 = vld [vmem:[#allocation5 + $0x48] sm:$0xff]  ;;  %v770_v15 = vld [vmem:[#allocation5 + $0x40] sm:$0xff] }
  0x38   : > { %460 = vmatpush.bf16.msra.mxu1 %v776_v3  ;;  %v684_v16 = vld [vmem:[%s1175_s10] sm:$0xf]  ;;  %v761_v17 = vld [vmem:[%s1175_s10 + $0x4] sm:$0xf0]  ;;  %v760_v18 = vld [vmem:[%s1175_s10 + $0x4] sm:$0xf] }
  0x39   : > { %v686_v19 = vld [vmem:[%s1175_s10 + $0x8] sm:$0xf0]  ;;  %v685_v20 = vor.u32 %v761_v17, %v684_v16  ;;  %v857_v29 = vpop.eup %856  ;;  %v853_v58 = vld [vmem:[%s1234_s2] ss:$0 sm:$0xff]  ;;  %s576_s10 = sshll.u32 %s573_s9, 4  ;;  %s577_s10 = int_to_ptr.hbm [resolvable:$true] %s576_s10 }
  0x3a   : > { %v689_v21 = vor.u32 %v760_v18, %v686_v19  ;;  %v480_v30 = vmul.f32 128.0, %v857_v29  ;;  %vm484_vm0 = vweird.f32 %v857_v29  ;;  %v854_v62 = vld [vmem:[%s1235_s3] ss:$0 sm:$0xff]  ;;  %s966_s27 = sshra.s32 %s577_s10, 4  ;;  %s967_s27 = int_to_ptr.hbm [resolvable:$true] %s966_s27 }
  0x3b   : > { %447 = vmatpush.bf16.msra.mxu0 %v767_v4  ;;  %v855_v1 = vld [vmem:[%s1236_s4] ss:$0 sm:$0xff]  ;;  %s968_s8 = scalar_lea.hbm %s967_s27, 16  ;;  %p973_p7 = scmp.lt.s32.totalorder %s967_s27, %s1238_s6 }
  0x3c   : > { %461 = vmatpush.bf16.msra.mxu1 %v775_v5  ;;  %v481_v31 = vsub.f32 1.0, %v480_v30  ;;  %v555_v4 = vld [vmem:[#allocation7] sm:$0xff]  ;;  %p969_p1 = scmp.ne.s32.totalorder %s967_s27, %s968_s8  ;;  %p974_p2 = scmp.lt.s32.totalorder %s972_s17, %s968_s8 }
  0x3e   : > { %v482_v32 = vmul.f32 %v857_v29, %v481_v31  ;;  %p970_p4 = pnand %p969_p1, %p1139_p3  ;;  %p975_p9 = por %p974_p2, %p973_p7 }
  0x3f   : > { %448 = vmatpush.bf16.msra.mxu0 %v766_v6 }
  0x40   : > { %462 = vmatpush.bf16.msra.mxu1 %v774_v7  ;;  %v483_v33 = vadd.f32 %v857_v29, %v482_v32  ;;  %p971_p8 = pneg %p970_p4 }
  0x42   : > { %v485_v34 = vsel %vm484_vm0, %v857_v29, %v483_v33  ;;  %p976_p10 = pnand %p975_p9, %p971_p8 }
  0x43   : > { %449 = vmatpush.bf16.msra.mxu0 %v765_v8 }
  0x44   : > { %463 = vmatpush.bf16.msra.mxu1 %v773_v9  ;;  %v534_v9 = vadd.s32 8, %v533_v59 }
  0x46   : > { %vm548_vm8 = vcmp.ge.s32.totalorder %v534_v9, 13 }
  0x47   : > { %450 = vmatpush.bf16.msra.mxu0 %v764_v10 }
  0x48   : > { %464 = vmatpush.bf16.msra.mxu1 %v772_v11 }
  0x4b   : > { %451 = vmatpush.bf16.msra.mxu0 %v763_v12 }
  0x4c   : > { %465 = vmatpush.bf16.msra.mxu1 %v771_v13  ;;  %v556_v13 = vld [vmem:[#allocation7 + $0x8] sm:$0xff] }
  0x4f   : > { %452 = vmatpush.bf16.msra.mxu0 %v762_v14 }
  0x50   : > { %466 = vmatpush.bf16.msra.mxu1 %v770_v15 }
  0x52   : > { %453 = vmatmul.bf16.vlgmr.msra.gmra.mxu0 %v685_v20 }
  0x53   : > { %467 = vmatmul.bf16.vlgmr.msra.gmra.mxu1 %v689_v21 }
  0xcf   : > { %v454_v22 = vpop.f32.mrf.mxu0 }
  0xd0   : > { %v468_v23 = vpop.f32.mrf.mxu1 }
  0xd1   : > { %v469_v24 = vadd.f32 %v468_v23, %v454_v22 }
  0xd3   : > { %475 = vadd.xlane.f32.xlu0 %v469_v24 }
  0xd7   : > { %v456_v25 = vpop.f32.mrf.mxu0 }
  0xd8   : > { %v470_v26 = vpop.f32.mrf.mxu1 }
  0xd9   : > { %v471_v27 = vadd.f32 %v470_v26, %v456_v25 }
  0xdb   : > { %477 = vadd.xlane.f32.xlu0 %v471_v27 }
 0x146   : > { %v476_v35 = vpop.xlane.xlu0 %475 }
 0x147   : > { %v486_v36 = vmul.f32 %v485_v34, %v476_v35 }
 0x149   : > { %v488_v37 = vsub.f32 %v469_v24, %v486_v36 }
 0x14b   : > { %v490_v38 = vmul.f32 %v488_v37, %v488_v37 }
 0x14d   : > { %492 = vadd.xlane.f32.xlu1 %v490_v38 }
 0x14e   : > { %v478_v39 = vpop.xlane.xlu0 %477 }
 0x14f   : > { %v487_v40 = vmul.f32 %v485_v34, %v478_v39 }
 0x151   : > { %v489_v41 = vsub.f32 %v471_v27, %v487_v40 }
 0x153   : > { %v491_v42 = vmul.f32 %v489_v41, %v489_v41 }
 0x155   : > { %494 = vadd.xlane.f32.xlu1 %v491_v42 }
 0x1c0   : > { %v493_v43 = vpop.xlane.xlu1 %492 }
 0x1c1   : > { %v496_v44 = vmul.f32 %v493_v43, %v485_v34 }
 0x1c3   : > { %v498_v45 = vadd.f32 1e-05, %v496_v44 }
 0x1c5   : > { %858 = vrsqrt.f32 %v498_v45  ;;  %vm506_vm2 = vweird.f32 %v498_v45 }
 0x1c8   : > { %v495_v46 = vpop.xlane.xlu1 %494 }
 0x1c9   : > { %v497_v47 = vmul.f32 %v495_v46, %v485_v34 }
 0x1cb   : > { %v859_v48 = vpop.eup %858  ;;  %v499_v49 = vadd.f32 1e-05, %v497_v47 }
 0x1cc   : > { %v501_v50 = vmul.f32 %v859_v48, %v498_v45  ;;  %vm507_vm1 = vweird.f32 %v859_v48 }
 0x1cd   : > { %860 = vrsqrt.f32 %v499_v49  ;;  %vm508_vm3 = vmor %vm506_vm2, %vm507_vm1  ;;  %vm516_vm6 = vweird.f32 %v499_v49 }
 0x1ce   : > { %v502_v51 = vmul.f32 %v859_v48, %v501_v50 }
 0x1d0   : > { %v503_v52 = vmul.f32 0.5, %v502_v51 }
 0x1d2   : > { %v504_v54 = vsub.f32 1.5, %v503_v52 }
 0x1d3   : > { %v861_v55 = vpop.eup %860 }
 0x1d4   : > { %v505_v56 = vmul.f32 %v859_v48, %v504_v54  ;;  %v511_v57 = vmul.f32 %v861_v55, %v499_v49  ;;  %vm517_vm5 = vweird.f32 %v861_v55 }
 0x1d5   : > { %vm518_vm7 = vmor %vm516_vm6, %vm517_vm5 }
 0x1d6   : > { %v509_v60 = vsel %vm508_vm3, %v859_v48, %v505_v56  ;;  %v512_v61 = vmul.f32 %v861_v55, %v511_v57 }
 0x1d7   : > { %v520_v63 = vmul.f32 %v509_v60, %v488_v37 }
 0x1d8   : > { %v513_v0 = vmul.f32 0.5, %v512_v61 }
 0x1d9   : > { %v525_v2 = vmul.f32 %v853_v58, %v520_v63 }
 0x1da   : > { %v514_v3 = vsub.f32 1.5, %v513_v0 }
 0x1db   : > { %v530_v5 = vadd.f32 %v854_v62, %v525_v2 }
 0x1dc   : > { %v515_v6 = vmul.f32 %v861_v55, %v514_v3 }
 0x1dd   : > { %v545_v7 = vsel %vm535_vm4, %v855_v1, %v530_v5 }
 0x1de   : > { %v557_v8 = vadd.f32 %v555_v4, %v545_v7  ;;  %v519_v10 = vsel %vm518_vm7, %v861_v55, %v515_v6 }
 0x1df   : > { %v521_v11 = vmul.f32 %v519_v10, %v489_v41 }
 0x1e0   : > { %559 = vst [vmem:[%s304_s15] sm:$0xff] %v557_v8 }
 0x1e1   : > { %v526_v12 = vmul.f32 %v853_v58, %v521_v11 }
 0x1e3   : > { %v531_v14 = vadd.f32 %v854_v62, %v526_v12 }
 0x1e5   : > { %v554_v15 = vsel %vm548_vm8, 0.0, %v531_v14 }
 0x1e6   : > { %v558_v16 = vadd.f32 %v556_v13, %v554_v15 }
 0x1e8   : > { %560 = vst [vmem:[%s304_s15 + $0x8] sm:$0xff] %v558_v16 }
 0x1e9   : > { %979 = shalt.err (!%p976_p10)
}
 0x1ea   : > { %s1031_s11 = smov 128   ;;  %s1032_s12 = smov 8  }
 0x1eb   : > { %789 = dma.vmem_to_hbm [thread:$0]  (%p1139_p3), %s575_s19, 256, %s577_s10, %s562_s25, %s1031_s11, %s1031_s11, %s1032_s12  }
 0x1ec PF: > { %p811_p11 = scmp.ge.s32.totalorder %s1022_s24, 2  ;;  %s591_s13 = sand.u32 1, %s1010_s21  }
 0x1ed   : > { %s592_s14 = scalar_lea.sflag [#allocation4], %s591_s13 }
 0x1ee   : > { %p803_p12 = pnand %p811_p11, %p1103_p6 }
 0x1f0   : > { %p804_p13 = pneg %p803_p12 }
 0x1f2   : > { %1005 = dma.done.wait (%p804_p13), %s592_s14, 256  }
 0x1f3   : > { %1007 = vsyncadd (%p804_p13), %s592_s14, 4294967040  ;;  %p20_p0 = scmp.ge.s32.totalorder %s1126_s20, 8   ;;  %s1248_s21 = smov %s1014_s22 }
 0x1f4   : > { %s1249_s22 = smov %s1018_s23  ;;  %s1250_s23 = smov %s1135_s30 }
 0x1f5   : > { %s1251_s24 = smov %s1126_s20  ;;  %22 = sbr.rel (!%p20_p0) target bundleno = 6 (0x6), region = 97 }
 0x1fa   :  { %598 = vsyncpa [#allocation3], 1 }
 0x1fb   :  { %600 = vsyncpa [#allocation3 + $0x1], 1 }
 0x1fc   :  { %601 = vsyncpa [#allocation6], 1 }
 0x1fd   :  { %602 = vsyncpa [#allocation4], 1 }
 0x1fe   :  { %604 = vsyncpa [#allocation4 + $0x1], 1 }

</bundles_post_ra>
